<compile_context>
chip_gen: v7x
topology: tpu7x:2x2x1
jax: 0.10.0
libtpu: 0.0.40
codegen_flags: <defaults>
</compile_context>

<pallas_src>
import jax
import jax.numpy as jnp
from jax.experimental import pallas as pl
from jax.experimental.pallas import tpu as pltpu


# --------------------------------------------------------------------------- #
# Kernel
# --------------------------------------------------------------------------- #
def _make_ell_kernel(M, Wy, R, block_rows, bps, needs_mask):
    """Kernel closure over static shape parameters.

    Inputs per grid step:
      y_ref   : (block_rows, Wy)
      mu_ref  : (block_rows, M*Wy)
      cov_ref : (block_rows, M*Wy)
      inv_ref : (1, Wy)           1/var tiled so column j -> dim j % D
    Output (written once per split at the flush step): (1, 8, 128) broadcast
    of the partial quadratic sum.  Scratch: (1, Wy) f32 accumulator.
    """

    def kernel(y_ref, mu_ref, cov_ref, inv_ref, out_ref, acc_ref):
        t = pl.program_id(1)

        @pl.when(t == 0)
        def _():
            acc_ref[...] = jnp.zeros_like(acc_ref)

        # Streaming hot path: (Y - mu)^2 + cov, pure VPU work on full tiles.
        y = y_ref[...].astype(jnp.float32)
        mu = mu_ref[...].astype(jnp.float32)
        cov = cov_ref[...].astype(jnp.float32)

        if M == 1:
            d = y - mu
            val = d * d + cov
        else:
            val = None
            for m in range(M):                       # static unroll, M small
                sl = slice(m * Wy, (m + 1) * Wy)
                dm = y - mu[:, sl]
                contrib = dm * dm + cov[:, sl]
                val = contrib if val is None else val + contrib

        if needs_mask:
            # Final row-block may extend past R; padded rows hold garbage.
            s = pl.program_id(0)
            row0 = (s * bps + t) * block_rows
            rows = row0 + jax.lax.broadcasted_iota(jnp.int32, val.shape, 0)
            val = jnp.where(rows < R, val, 0.0)

        # Small accumulator (decoupled from block size): fold rows each step.
        acc_ref[...] += jnp.sum(val, axis=0, keepdims=True)

        @pl.when(t == bps - 1)
        def _():
            # Column j always maps to output dim j % D, so the 1/var scale
            # commutes with the row sum and is applied once here.
            total = -0.5 * jnp.sum(acc_ref[...] * inv_ref[...])
            out_ref[...] = jnp.full(out_ref.shape, total, dtype=jnp.float32)

    return kernel


# --------------------------------------------------------------------------- #
# Host-side helpers
# --------------------------------------------------------------------------- #
def _vmem_capacity_bytes():
    try:
        info = pltpu.get_tpu_info()
        cap = getattr(info, "vmem_capacity_bytes", None)
        if cap:
            return int(cap)
    except Exception:
        pass
    return 64 * (1 << 20)          # conservative (v7x-sized) default


def _has_two_tensorcores():
    try:
        kind = (jax.devices()[0].device_kind or "").lower()
    except Exception:
        return False
    return ("v7" in kind) or ("7x" in kind)


def _choose_fold(T, D, min_w=256, max_w=8192):
    """Smallest k with k | T and k*D >= min_w (lane-dense slab width), bounded
    by max_w; falls back to the largest admissible divisor (possibly 1)."""
    best = 1
    for k in range(1, T + 1):
        if T % k:
            continue
        if k * D > max_w:
            break
        best = k
        if k * D >= min_w:
            break
    return best


def _padw(w):                       # lane padding of the minor dim in VMEM
    return -(-w // 128) * 128


# --------------------------------------------------------------------------- #
# Public entry point (== Gaussian.forward / expected_loglik)
# --------------------------------------------------------------------------- #
def gaussian_expected_loglik(Y, mu, cov, output_variance, *,
                             block_rows=None, n_split=None):
    T, D = Y.shape
    if mu.ndim == 2:                 # allow (T, D) -> (T, 1, D)
        mu = mu[:, None, :]
        cov = cov[:, None, :]
    M = mu.shape[1]
    var = output_variance.reshape(-1).astype(jnp.float32)

    # ---- free, order-preserving views (no pad, no broadcast) ---------------
    if M == 1:
        k = _choose_fold(T, D)
        R, Wy, m_eff = T // k, k * D, 1
        y2 = Y.reshape(R, Wy)
        mu2 = mu.reshape(R, Wy)
        cov2 = cov.reshape(R, Wy)
    else:
        R, Wy, m_eff = T, D, M
        y2 = Y                                   # streamed once; never tiled
        mu2 = mu.reshape(T, M * D)               # free trailing-dim merge
        cov2 = cov.reshape(T, M * D)

    inv = jnp.tile(1.0 / var, Wy // D).reshape(1, Wy)

    # ---- per-chip block / VMEM sizing ---------------------------------------
    vmem_cap = _vmem_capacity_bytes()
    if vmem_cap <= 64 * (1 << 20):               # v7x-class (64 MiB VMEM)
        per_input_target, vmem_limit = 2 << 20, 40 << 20
    else:                                        # v5e / v6e (128 MiB VMEM)
        per_input_target, vmem_limit = 4 << 20, 64 << 20

    itemsizes = [y2.dtype.itemsize, mu2.dtype.itemsize, cov2.dtype.itemsize]
    sub_mult = 8 * max(1, 4 // min(itemsizes))   # 8 f32 / 16 bf16 / 32 int8
    row_bytes = (_padw(Wy) * itemsizes[0]
                 + _padw(m_eff * Wy) * (itemsizes[1] + itemsizes[2]))
    if block_rows is None:
        block_rows = (3 * per_input_target) // (2 * row_bytes)
    if block_rows >= R:
        block_rows = R                           # single full-extent block
    else:
        block_rows = max(sub_mult, (block_rows // sub_mult) * sub_mult)

    n_row_blocks = -(-R // block_rows)
    needs_mask = (n_row_blocks * block_rows != R)

    # Split axis: one per TensorCore; only used when it divides the blocks.
    if n_split is None:
        n_split = 2 if _has_two_tensorcores() else 1
    n_split = max(1, min(n_split, n_row_blocks))
    if n_row_blocks % n_split:
        n_split = 1
    bps = n_row_blocks // n_split

    row_map = lambda s, t: (s * bps + t, 0)
    kernel = _make_ell_kernel(m_eff, Wy, R, block_rows, bps, needs_mask)

    bytes_accessed = int(y2.size * itemsizes[0] + mu2.size * itemsizes[1]
                         + cov2.size * itemsizes[2] + inv.size * 4
                         + n_split * 8 * 128 * 4)
    cost = pl.CostEstimate(flops=int(4 * T * M * D), transcendentals=0,
                           bytes_accessed=bytes_accessed)

    partials = pl.pallas_call(
        kernel,
        out_shape=jax.ShapeDtypeStruct((n_split, 8, 128), jnp.float32),
        grid_spec=pltpu.PrefetchScalarGridSpec(
            num_scalar_prefetch=0,
            grid=(n_split, bps),
            in_specs=[
                pl.BlockSpec((block_rows, Wy), row_map),           # Y
                pl.BlockSpec((block_rows, m_eff * Wy), row_map),   # mu
                pl.BlockSpec((block_rows, m_eff * Wy), row_map),   # cov
                pl.BlockSpec((1, Wy), lambda s, t: (0, 0)),        # 1/var
            ],
            out_specs=pl.BlockSpec((1, 8, 128), lambda s, t: (s, 0, 0)),
            scratch_shapes=[pltpu.VMEM((1, Wy), jnp.float32)],
        ),
        compiler_params=pltpu.CompilerParams(
            # TODO(synk): on v7x, switch leading axis to pltpu.CORE_PARALLEL if
            # xprof shows plain "parallel" is not sharded across the 2 TCs.
            dimension_semantics=("parallel", "arbitrary"),
            vmem_limit_bytes=vmem_limit),
        cost_estimate=cost,
    )(y2, mu2, cov2, inv)

    quad = jnp.sum(partials[:, 0, 0])
    const = -0.5 * T * jnp.sum(jnp.log(var))
    return quad + const


# --------------------------------------------------------------------------- #
# Reference + self-test
# --------------------------------------------------------------------------- #
def reference_ell(y, mu, cov, output_variance):
    T, D = y.shape
    if mu.ndim == 2:
        mu = mu[:, None, :]
        cov = cov[:, None, :]
    ysq = y * y
    term = (ysq[:, None, :] - 2.0 * y[:, None, :] * mu + mu * mu + cov) \
        / output_variance.reshape(1, 1, -1)
    return -0.5 * jnp.sum(term) - 0.5 * T * jnp.sum(jnp.log(output_variance))


def _run_case(key, T, M, D, **kw):
    k_y, k_mu, k_cov = jax.random.split(key, 3)
    y = jax.random.normal(k_y, (T, D), dtype=jnp.float32)
    mu = jax.random.normal(k_mu, (T, M, D), dtype=jnp.float32)
    cov = 0.1 + jax.random.uniform(k_cov, (T, M, D), dtype=jnp.float32)
    output_variance = 0.5 + 0.1 * jnp.arange(D, dtype=jnp.float32)

    ell = jax.block_until_ready(
        gaussian_expected_loglik(y, mu, cov, output_variance, **kw))
    ref = reference_ell(y, mu, cov, output_variance)
    assert jnp.allclose(ell, ref, rtol=1e-5, atol=5e-2), \
        (T, M, D, float(ell), float(ref))


if __name__ == "__main__":
    key = jax.random.PRNGKey(0)
    k1, k2, k3, k4 = jax.random.split(key, 4)

    # Module-like single-trial shapes: Y [T, D]; mu/cov [T, M, D] with M == 1.
    _run_case(k1, T=16, M=1, D=8)
    # Ragged multi-block slab path (small forced block exercises masking/grid).
    _run_case(k2, T=360, M=1, D=8, block_rows=8)
    # M > 1 path (Y streamed once, never broadcast-materialized).
    _run_case(k3, T=16, M=3, D=8)
    # M > 1, ragged multi-block path.
    _run_case(k4, T=100, M=2, D=8, block_rows=8)

    print("KERNEL_OK")
</pallas_src>

<mosaic_0001>
module attributes {stable_mosaic.version = 11 : i64} {
  func.func @kernel(%arg0: i32, %arg1: i32, %arg2: memref<1x128xf32, #tpu.memory_space<vmem>>, %arg3: memref<1x128xf32, #tpu.memory_space<vmem>>, %arg4: memref<1x128xf32, #tpu.memory_space<vmem>>, %arg5: memref<1x128xf32, #tpu.memory_space<vmem>>, %arg6: memref<1x8x128xf32, #tpu.memory_space<vmem>>, %arg7: memref<1x128xf32, #tpu.memory_space<vmem>>) attributes {dimension_semantics = [#tpu.dimension_semantics<parallel>, #tpu.dimension_semantics<arbitrary>], iteration_bounds = array<i64: 1, 1>, scalar_prefetch = 0 : i64, scratch_operands = 1 : i64, tpu.core_type = #tpu.core_type<tc>, window_params = [{transform_indices = @transform_0, window_bounds = array<i64: 1, 128>}, {transform_indices = @transform_1, window_bounds = array<i64: 1, 128>}, {transform_indices = @transform_2, window_bounds = array<i64: 1, 128>}, {pipeline_mode = #tpu.pipeline_mode<synchronous>, transform_indices = @transform_3, window_bounds = array<i64: 1, 128>}, {transform_indices = @transform_4, window_bounds = array<i64: 1, 8, 128>}]} {
    %c0_i32 = arith.constant 0 : i32
    %0 = arith.cmpi eq, %arg1, %c0_i32 : i32
    %1 = arith.extui %0 : i1 to i32
    %c0_i32_0 = arith.constant 0 : i32
    %2 = arith.cmpi ne, %1, %c0_i32_0 : i32
    scf.if %2 {
      %cst_12 = arith.constant 0.000000e+00 : f32
      %17 = vector.broadcast %cst_12 : f32 to vector<1x128xf32>
      %c0_13 = arith.constant 0 : index
      %c0_14 = arith.constant 0 : index
      %18 = vector.load %arg7[%c0_13, %c0_14] : memref<1x128xf32, #tpu.memory_space<vmem>>, vector<1x128xf32>
      tpu.vector_store %arg7[%c0_13, %c0_14], %17 {strides = array<i32>} : memref<1x128xf32, #tpu.memory_space<vmem>>, vector<1x128xf32>,
    } else {
    }
    %c0 = arith.constant 0 : index
    %c0_1 = arith.constant 0 : index
    %3 = vector.load %arg2[%c0, %c0_1] : memref<1x128xf32, #tpu.memory_space<vmem>>, vector<1x128xf32>
    %c0_2 = arith.constant 0 : index
    %c0_3 = arith.constant 0 : index
    %4 = vector.load %arg3[%c0_2, %c0_3] : memref<1x128xf32, #tpu.memory_space<vmem>>, vector<1x128xf32>
    %c0_4 = arith.constant 0 : index
    %c0_5 = arith.constant 0 : index
    %5 = vector.load %arg4[%c0_4, %c0_5] : memref<1x128xf32, #tpu.memory_space<vmem>>, vector<1x128xf32>
    %6 = arith.subf %3, %4 : vector<1x128xf32>
    %7 = arith.mulf %6, %6 : vector<1x128xf32>
    %8 = arith.addf %7, %5 : vector<1x128xf32>
    %c0_6 = arith.constant 0 : index
    %c0_7 = arith.constant 0 : index
    %9 = vector.load %arg7[%c0_6, %c0_7] : memref<1x128xf32, #tpu.memory_space<vmem>>, vector<1x128xf32>
    %cst = arith.constant dense<0.000000e+00> : vector<128xf32>
    %10 = vector.multi_reduction <add>, %8, %cst [0] : vector<1x128xf32> to vector<128xf32>
    %11 = vector.shape_cast %10 : vector<128xf32> to vector<1x128xf32>
    %12 = arith.addf %9, %11 : vector<1x128xf32>
    %c0_8 = arith.constant 0 : index
    %c0_9 = arith.constant 0 : index
    %13 = vector.load %arg7[%c0_8, %c0_9] : memref<1x128xf32, #tpu.memory_space<vmem>>, vector<1x128xf32>
    tpu.vector_store %arg7[%c0_8, %c0_9], %12 {strides = array<i32>} : memref<1x128xf32, #tpu.memory_space<vmem>>, vector<1x128xf32>,
    %c0_i32_10 = arith.constant 0 : i32
    %14 = arith.cmpi eq, %arg1, %c0_i32_10 : i32
    %15 = arith.extui %14 : i1 to i32
    %c0_i32_11 = arith.constant 0 : i32
    %16 = arith.cmpi ne, %15, %c0_i32_11 : i32
    scf.if %16 {
      %c0_12 = arith.constant 0 : index
      %c0_13 = arith.constant 0 : index
      %17 = vector.load %arg7[%c0_12, %c0_13] : memref<1x128xf32, #tpu.memory_space<vmem>>, vector<1x128xf32>
      %c0_14 = arith.constant 0 : index
      %c0_15 = arith.constant 0 : index
      %18 = vector.load %arg5[%c0_14, %c0_15] : memref<1x128xf32, #tpu.memory_space<vmem>>, vector<1x128xf32>
      %19 = arith.mulf %17, %18 : vector<1x128xf32>
      %20 = vector.shape_cast %19 : vector<1x128xf32> to vector<1x1x128xf32>
      %cst_16 = arith.constant dense<0.000000e+00> : vector<1xf32>
      %21 = vector.multi_reduction <add>, %20, %cst_16 [1, 2] : vector<1x1x128xf32> to vector<1xf32>
      %22 = vector.shape_cast %21 : vector<1xf32> to vector<1x1x1xf32>
      %23 = vector.extract %22[0, 0, 0] : f32 from vector<1x1x1xf32>
      %cst_17 = arith.constant -5.000000e-01 : f32
      %24 = arith.mulf %cst_17, %23 : f32
      %25 = vector.broadcast %24 : f32 to vector<1x8x128xf32>
      %c0_18 = arith.constant 0 : index
      %c0_19 = arith.constant 0 : index
      %c0_20 = arith.constant 0 : index
      %26 = vector.load %arg6[%c0_18, %c0_19, %c0_20] : memref<1x8x128xf32, #tpu.memory_space<vmem>>, vector<1x8x128xf32>
      tpu.vector_store %arg6[%c0_18, %c0_19, %c0_20], %25 {strides = array<i32>} : memref<1x8x128xf32, #tpu.memory_space<vmem>>, vector<1x8x128xf32>,
    } else {
    }
    return
  }
  func.func @transform_0(%arg0: i32, %arg1: i32) -> (i32, i32) {
    %c1_i32 = arith.constant 1 : i32
    %0 = arith.muli %arg0, %c1_i32 : i32
    %1 = arith.addi %0, %arg1 : i32
    %c0_i32 = arith.constant 0 : i32
    %c0_i32_0 = arith.constant 0 : i32
    return %1, %c0_i32 : i32, i32
  }
  func.func @transform_1(%arg0: i32, %arg1: i32) -> (i32, i32) {
    %c1_i32 = arith.constant 1 : i32
    %0 = arith.muli %arg0, %c1_i32 : i32
    %1 = arith.addi %0, %arg1 : i32
    %c0_i32 = arith.constant 0 : i32
    %c0_i32_0 = arith.constant 0 : i32
    return %1, %c0_i32 : i32, i32
  }
  func.func @transform_2(%arg0: i32, %arg1: i32) -> (i32, i32) {
    %c1_i32 = arith.constant 1 : i32
    %0 = arith.muli %arg0, %c1_i32 : i32
    %1 = arith.addi %0, %arg1 : i32
    %c0_i32 = arith.constant 0 : i32
    %c0_i32_0 = arith.constant 0 : i32
    return %1, %c0_i32 : i32, i32
  }
  func.func @transform_3(%arg0: i32, %arg1: i32) -> (i32, i32) {
    %c0_i32 = arith.constant 0 : i32
    %c0_i32_0 = arith.constant 0 : i32
    %c0_i32_1 = arith.constant 0 : i32
    return %c0_i32, %c0_i32_0 : i32, i32
  }
  func.func @transform_4(%arg0: i32, %arg1: i32) -> (i32, i32, i32) {
    %c0_i32 = arith.constant 0 : i32
    %c0_i32_0 = arith.constant 0 : i32
    %c0_i32_1 = arith.constant 0 : i32
    return %arg0, %c0_i32, %c0_i32_0 : i32, i32, i32
  }
}

</mosaic_0001>

<bundles_post_ra>
// kernel: tpu_custom_call.1
= control target key start
LH: loop header
LB: loop body
LE: loop exit
PB: predicated region body
PF: predicated region fallthrough
CT: control target
= control target key end

     0   :  { %9 = vsyncpa [#allocation4], 0  ;;  %s232_s0 = inlined_call_operand.hbm [shape: f32[1,128], index: 0, kind: input, shape index: {}]   ;;  %s233_s1 = inlined_call_operand.vmem [shape: f32[1,128], index: 1, kind: input, shape index: {}]   ;;  %s234_s2 = inlined_call_operand.vmem [shape: f32[1,128], index: 2, kind: input, shape index: {}]   ;;  %s235_s3 = inlined_call_operand.vmem [shape: f32[1,128], index: 3, kind: input, shape index: {}]   ;;  %s236_s4 = inlined_call_operand.hbm [shape: f32[1,8,128], index: 4, kind: output, shape index: {}]  }
   0x1   :  { %10 = vsyncpa [#allocation5], 0  ;;  %s171_s15 = smov [#allocation3]   ;;  %s123_s19 = scalar_lea.hbm %s232_s0, 16 }
   0x2   :  { %s20_s16 = sshll.u32 %s171_s15, 4  ;;  %p124_p0 = scmp.ne.s32.totalorder %s232_s0, %s123_s19  ;;  %s21_s16 = int_to_ptr.vmem [resolvable:$true] %s20_s16 }
   0x3   :  { %p127_p1 = scmp.lt.u32.totalorder %s123_s19, %s232_s0 }
   0x5   :  { %p129_p2 = pnand %p127_p1, %p124_p0 }
   0x7   :  { %132 = shalt.err (!%p129_p2)
}
   0x8   :  { %s133_s24 = scalar_lea.vmem %s21_s16, 16  ;;  %s137_s25 = scalar_lea.vmem %s21_s16, 32 }
   0x9   :  { %p134_p3 = scmp.ne.s32.totalorder %s21_s16, %s133_s24  ;;  %p138_p4 = scmp.lt.s32.totalorder %s21_s16, %s21_s16 }
   0xa   :  { %p139_p5 = scmp.lt.s32.totalorder %s137_s25, %s133_s24 }
   0xc   :  { %p140_p6 = por %p139_p5, %p138_p4 }
   0xe   :  { %p141_p7 = pnand %p140_p6, %p134_p3 }
  0x10   :  { %144 = shalt.err (!%p141_p7)
}
  0x11   :  { %23 = dma.hbm_to_vmem [thread:$0]  %s232_s0, 16, %s21_s16, [#allocation4]  }
  0x12   :  { %167 = dma.done.wait [#allocation4], 16  }
  0x13   :  { %168 = vsyncadd [#allocation4], 4294967280  ;;  %v172_v0 = vmov 0.0   ;;  %v67_v1 = vld [vmem:[#allocation3] sm:$0x1]  ;;  %vm83_vm0 = vcmask 1040384  }
  0x14   :  { %66 = vst [vmem:[#allocation2] sm:$0x1] %v172_v0  ;;  %v68_v2 = vld [vmem:[%s233_s1] sm:$0x1]  ;;  %s173_s1 = smov [#allocation6]  }
  0x15   :  { %v70_v3 = vsub.f32 %v67_v1, %v68_v2  ;;  %v69_v4 = vld [vmem:[%s234_s2] sm:$0x1]  ;;  %s103_s2 = sshll.u32 %s173_s1, 4  ;;  %s104_s2 = int_to_ptr.vmem [resolvable:$true] %s103_s2 }
  0x16   :  { %v81_v9 = vld [vmem:[%s235_s3] sm:$0x1]  ;;  %s145_s3 = scalar_lea.vmem %s104_s2, 128  ;;  %p150_p9 = scmp.lt.s32.totalorder %s104_s2, %s104_s2 }
  0x17   :  { %v71_v5 = vmul.f32 %v70_v3, %v70_v3  ;;  %p146_p8 = scmp.ne.s32.totalorder %s104_s2, %s145_s3  ;;  %p151_p10 = scmp.lt.s32.totalorder %s145_s3, %s145_s3 }
  0x19   :  { %v72_v7 = vadd.f32 %v71_v5, %v69_v4  ;;  %p152_p11 = por %p151_p10, %p150_p9 }
  0x1b   :  { %v73_v6 = vld [vmem:[#allocation2] sm:$0x1]  ;;  %p153_p12 = pnand %p152_p11, %p146_p8 }
  0x1c   :  { %v75_v8 = vadd.f32 %v73_v6, %v72_v7 }
  0x1e   :  { %76 = vst [vmem:[#allocation2] sm:$0x1] %v75_v8 }
  0x25   :  { %v80_v10 = vld [vmem:[#allocation2] sm:$0x1] }
  0x26   :  { %v82_v11 = vmul.f32 %v81_v9, %v80_v10 }
  0x28   :  { %v84_v12 = vsel %vm83_vm0, %v82_v11, 0.0 }
  0x29   :  { %85 = vadd.xlane.f32.xlu0 %v84_v12 }
  0xb6   :  { %v86_v13 = vpop.xlane.xlu0 %85 }
  0xb7   :  { %v87_v14 = vrot.slane %v86_v13, 4 }
  0xb9   :  { %v88_v15 = vadd.f32 %v87_v14, %v86_v13 }
  0xbb   :  { %v89_v16 = vrot.slane %v88_v15, 2 }
  0xbd   :  { %v90_v17 = vadd.f32 %v89_v16, %v88_v15 }
  0xbf   :  { %v91_v18 = vrot.slane %v90_v17, 1 }
  0xc1   :  { %v92_v19 = vadd.f32 %v91_v18, %v90_v17 }
  0xc3   :  { %118 = vpush %v92_v19 }
  0xf4   :  { %s119_s7 = spop %118 }
  0xf5   :  { %s94_s8 = smul.f32 -0.5, %s119_s7 }
  0xf7   :  { %v95_v20 = vstv %s94_s8 }
  0xf8   :  { %96 = vst [vmem:[#allocation6] sm:$0xff] %v95_v20 }
  0xf9   :  { %156 = shalt.err (!%p153_p12)
}
  0xfa   :  { %s157_s11 = scalar_lea.hbm %s236_s4, 128 }
  0xfb   :  { %p158_p13 = scmp.ne.s32.totalorder %s236_s4, %s157_s11  ;;  %p161_p0 = scmp.lt.u32.totalorder %s157_s11, %s236_s4 }
  0xfd   :  { %p163_p1 = pnand %p161_p0, %p158_p13 }
  0xff   :  { %166 = shalt.err (!%p163_p1)
}
 0x100   :  { %106 = dma.vmem_to_hbm [thread:$0]  %s104_s2, 128, %s236_s4, [#allocation5]  }
 0x101   :  { %169 = dma.done.wait [#allocation5], 128  }
 0x102   :  { %170 = vsyncadd [#allocation5], 4294967168 }
 0x103   :  { %110 = vsyncpa [#allocation4], 1 }
 0x104   :  { %111 = vsyncpa [#allocation5], 1 }

</bundles_post_ra>
